<compile_context>
chip_gen: v7x
topology: tpu7x:2x2x1
jax: 0.10.0
libtpu: 0.0.40
codegen_flags: <defaults>
</compile_context>

<pallas_src>
import math
from functools import lru_cache, partial

import jax
import jax.numpy as jnp
import numpy as np
from jax.experimental import pallas as pl
from jax.experimental.pallas import tpu as pltpu


# Vocab sizes in the order TemporalEmbedding.forward reads x[:, :, f].
_SIZES_H = (13, 32, 7, 24)
_SIZES_T = (13, 32, 7, 24, 4)


def _round_up(a, b):
    return ((a + b - 1) // b) * b


def fixed_embedding_table(c_in, d_model):
    """Numpy copy of FixedEmbedding.__init__ (sinusoidal, non-trainable)."""
    w = np.zeros((c_in, d_model), dtype=np.float32)
    position = np.arange(0, c_in, dtype=np.float32)[:, None]
    div_term = np.exp(
        np.arange(0, d_model, 2, dtype=np.float32) * -(math.log(10000.0) / d_model)
    )
    w[:, 0::2] = np.sin(position * div_term)
    w[:, 1::2] = np.cos(position * div_term)
    return w


@lru_cache(maxsize=None)
def build_combined_table(d_model, freq="h"):
    """Concatenated fixed tables [V_pad=128, d_model] + per-feature row offsets."""
    assert d_model % 2 == 0, "FixedEmbedding requires an even d_model"
    sizes = _SIZES_T if freq == "t" else _SIZES_H
    tables = tuple(fixed_embedding_table(s, d_model) for s in sizes)
    offsets = tuple(int(o) for o in np.cumsum((0,) + sizes[:-1]))
    table = np.concatenate(tables, axis=0)          # [V, d_model]
    v_pad = _round_up(table.shape[0], 128)          # K=128: do NOT pad to 256
    table_pad = np.zeros((v_pad, d_model), dtype=np.float32)
    table_pad[: table.shape[0], :] = table
    return tables, offsets, table_pad


def _tile_n_from_vmem_budget(d_model, out_itemsize, table_itemsize, v_pad,
                             budget_bytes):
    """Largest tile_n (multiple of 8, <=4096) keeping double-buffered blocks
    within budget_bytes: 2*(out block + lane-padded idx block) + 2*table."""
    d_vmem = _round_up(d_model, 128)                # VMEM lane padding
    fixed = 2 * v_pad * d_vmem * table_itemsize     # table (double-buffered)
    per_row = 2 * (d_vmem * out_itemsize + 128 * 4)  # out row + idx row (lane-padded)
    tile = (budget_bytes - fixed) // per_row
    tile = max(8, min(4096, int(tile)))
    tile -= tile % 8
    return max(8, tile)


def _pick_tile_n(n, tile_n_max):
    """Pick (tile_n, n_pad).  Prefers a tile that divides n exactly (so the
    wrapper never re-reads the output to strip padding -- that slice is a full
    extra HBM pass) and, for multi-tile grids, an even grid length so v7x's
    two TensorCores get balanced work."""
    n8 = _round_up(n, 8)
    if n8 <= tile_n_max:                            # single tile
        return n8, n8
    t_max = tile_n_max - tile_n_max % 8
    first_div = None
    for cand in range(t_max, 7, -8):
        if n % cand == 0:
            if (n // cand) % 2 == 0:
                return cand, n                      # exact fit + even grid
            if first_div is None:
                first_div = cand
    if first_div is not None:
        return first_div, n                         # exact fit, odd grid
    return t_max, _round_up(n, t_max)               # fallback: pad + slice


def _temporal_embed_kernel(idx_ref, table_ref, out_ref, *, offsets):
    # idx_ref:   [TILE_N, F]       int32     raw time features for this tile
    # table_ref: [V_pad, d_model]  bf16/f32  combined fixed table (resident)
    # out_ref:   [TILE_N, d_model] out_dtype
    idx = idx_ref[...]
    v_pad = table_ref.shape[0]

    rows = jax.lax.broadcasted_iota(jnp.int32, (1, v_pad), 1)   # small iota
    # Feature vocabularies occupy disjoint row ranges of the combined table,
    # so OR-ing the per-feature one-hot masks == summing them, and
    # mask @ table == sum of the F embedding lookups.
    mask = (idx[:, 0:1] + offsets[0]) == rows
    for f in range(1, len(offsets)):                # F is small & static (4/5)
        mask = mask | ((idx[:, f:f + 1] + offsets[f]) == rows)

    onehot = mask.astype(table_ref.dtype)           # single cast before the MXU
    acc = jnp.dot(onehot, table_ref[...], preferred_element_type=jnp.float32)
    out_ref[...] = acc.astype(out_ref.dtype)


def temporal_embedding(x, d_model, freq="h", *, table_dtype=jnp.bfloat16,
                       out_dtype=jnp.float32, vmem_budget_bytes=16 << 20):
    """x: int array [B, L, F] (F >= 4, or >= 5 when freq=='t').
    Returns [B, L, d_model] of out_dtype.  table_dtype=jnp.float32 gives
    bit-faithful parity with the PyTorch module; out_dtype=jnp.bfloat16 halves
    the dominant HBM writeback when downstream accepts it."""
    B, L, F_in = x.shape
    _, offsets, table_np = build_combined_table(d_model, freq)
    F = len(offsets)
    assert F_in >= F, f"x must have at least {F} time features"

    v_pad = table_np.shape[0]
    table_j = jnp.asarray(table_np, dtype=table_dtype)
    out_itemsize = np.dtype(out_dtype).itemsize
    table_itemsize = np.dtype(table_dtype).itemsize

    N = B * L
    tile_n_max = _tile_n_from_vmem_budget(
        d_model, out_itemsize, table_itemsize, v_pad, vmem_budget_bytes)
    tile_n, n_pad = _pick_tile_n(N, tile_n_max)

    # Free reshape to [N, F]; row padding (rare) hits valid index 0 and is
    # sliced off afterwards.
    idx = x.reshape(N, F_in)[:, :F].astype(jnp.int32)
    if n_pad != N:
        idx = jnp.pad(idx, ((0, n_pad - N), (0, 0)))

    d_vmem = _round_up(d_model, 128)
    vmem_limit = int(_round_up(
        2 * (tile_n * d_vmem * out_itemsize            # out block (double-buffered)
             + tile_n * 128 * 4                        # idx block (lane-padded)
             + v_pad * d_vmem * table_itemsize)        # table
        + (4 << 20), 1 << 20))                         # scratch headroom

    cost = pl.CostEstimate(
        flops=2 * n_pad * v_pad * d_model,
        transcendentals=0,
        bytes_accessed=(n_pad * F * 4
                        + v_pad * d_model * table_itemsize
                        + n_pad * d_model * out_itemsize),
    )

    out = pl.pallas_call(
        partial(_temporal_embed_kernel, offsets=offsets),
        out_shape=jax.ShapeDtypeStruct((n_pad, d_model), out_dtype),
        grid=(n_pad // tile_n,),
        in_specs=[
            pl.BlockSpec((tile_n, F), lambda i: (i, 0)),        # idx: tiled over N
            pl.BlockSpec((v_pad, d_model), lambda i: (0, 0)),   # table: resident
        ],
        out_specs=pl.BlockSpec((tile_n, d_model), lambda i: (i, 0)),
        compiler_params=pltpu.CompilerParams(
            dimension_semantics=("parallel",),                  # megacore on v7x
            vmem_limit_bytes=vmem_limit,
        ),
        cost_estimate=cost,
    )(idx, table_j)

    if n_pad != N:              # only when N isn't a tile multiple (rare path)
        out = out[:N]
    return out.reshape(B, L, d_model)


def _numpy_ref(x_np, d_model, freq, quantize_bf16):
    """Pure-numpy mirror of TemporalEmbedding.forward."""
    tables, _, _ = build_combined_table(d_model, freq)
    B, L, _ = x_np.shape
    ref = np.zeros((B, L, d_model), dtype=np.float32)
    for f, tbl in enumerate(tables):
        if quantize_bf16:
            tbl = np.asarray(jnp.asarray(tbl, dtype=jnp.bfloat16).astype(jnp.float32))
        ref += tbl[x_np[:, :, f]]
    return ref


if __name__ == "__main__":
    B, L = 2, 8

    key = jax.random.PRNGKey(0)
    ks = jax.random.split(key, 5)
    month   = jax.random.randint(ks[0], (B, L), 0, 13)
    day     = jax.random.randint(ks[1], (B, L), 0, 32)
    weekday = jax.random.randint(ks[2], (B, L), 0, 7)
    hour    = jax.random.randint(ks[3], (B, L), 0, 24)
    minute  = jax.random.randint(ks[4], (B, L), 0, 4)
    x = jnp.stack([month, day, weekday, hour, minute], axis=-1).astype(jnp.int32)
    x_np = np.asarray(x)

    # (1) freq='t' (all 5 embeddings), small non-128 d_model (masked tail stores).
    d_model = 32
    out = jax.block_until_ready(temporal_embedding(x, d_model=d_model, freq="t"))
    assert out.shape == (B, L, d_model)
    ref_f32 = _numpy_ref(x_np, d_model, "t", quantize_bf16=False)
    ref_q = _numpy_ref(x_np, d_model, "t", quantize_bf16=True)
    assert np.allclose(np.asarray(out), ref_f32, atol=5e-2), "t: mismatch vs f32 ref"
    assert np.allclose(np.asarray(out), ref_q, atol=1e-5), "t: mismatch vs bf16-table ref"

    # (2) freq='h' (4 embeddings), lane-dense d_model=128, f32 table for exact parity.
    d_model = 128
    out_h = jax.block_until_ready(
        temporal_embedding(x, d_model=d_model, freq="h", table_dtype=jnp.float32))
    assert out_h.shape == (B, L, d_model)
    ref_h = _numpy_ref(x_np, d_model, "h", quantize_bf16=False)
    assert np.allclose(np.asarray(out_h), ref_h, atol=1e-5), "h: mismatch vs f32 ref"

    # (3) N not a multiple of 8 -> exercises the pad + slice fallback path.
    out_p = jax.block_until_ready(temporal_embedding(x[:, :7, :], d_model=32, freq="t"))
    ref_p = _numpy_ref(x_np[:, :7, :], 32, "t", quantize_bf16=True)
    assert out_p.shape == (B, 7, 32)
    assert np.allclose(np.asarray(out_p), ref_p, atol=1e-5), "pad: mismatch vs ref"

    print("KERNEL_OK")
</pallas_src>

<mosaic_0001>
module attributes {stable_mosaic.version = 11 : i64} {
  func.func @_temporal_embed_kernel(%arg0: i32, %arg1: memref<16x5xi32, #tpu.memory_space<vmem>>, %arg2: memref<128x32xbf16, #tpu.memory_space<vmem>>, %arg3: memref<16x32xf32, #tpu.memory_space<vmem>>) attributes {dimension_semantics = [#tpu.dimension_semantics<parallel>], iteration_bounds = array<i64: 1>, scalar_prefetch = 0 : i64, scratch_operands = 0 : i64, tpu.core_type = #tpu.core_type<tc>, window_params = [{transform_indices = @transform_0, window_bounds = array<i64: 16, 5>}, {pipeline_mode = #tpu.pipeline_mode<synchronous>, transform_indices = @transform_1, window_bounds = array<i64: 128, 32>}, {transform_indices = @transform_2, window_bounds = array<i64: 16, 32>}]} {
    %c0 = arith.constant 0 : index
    %c0_0 = arith.constant 0 : index
    %0 = vector.load %arg1[%c0, %c0_0] : memref<16x5xi32, #tpu.memory_space<vmem>>, vector<16x5xi32>
    %1 = tpu.iota {dimensions = array<i32: 1>} : vector<1x128xi32>
    %2 = vector.extract_strided_slice %0 {offsets = [0, 0], sizes = [16, 1], strides = [1, 1]} : vector<16x5xi32> to vector<16x1xi32>
    %c0_i32 = arith.constant 0 : i32
    %3 = vector.broadcast %c0_i32 : i32 to vector<16x1xi32>
    %4 = arith.addi %2, %3 : vector<16x1xi32>
    %5 = vector.broadcast %4 : vector<16x1xi32> to vector<16x128xi32>
    %6 = vector.broadcast %1 : vector<1x128xi32> to vector<16x128xi32>
    %7 = arith.cmpi eq, %5, %6 : vector<16x128xi32>
    %8 = vector.extract_strided_slice %0 {offsets = [0, 1], sizes = [16, 1], strides = [1, 1]} : vector<16x5xi32> to vector<16x1xi32>
    %c13_i32 = arith.constant 13 : i32
    %9 = vector.broadcast %c13_i32 : i32 to vector<16x1xi32>
    %10 = arith.addi %8, %9 : vector<16x1xi32>
    %11 = vector.broadcast %10 : vector<16x1xi32> to vector<16x128xi32>
    %12 = vector.broadcast %1 : vector<1x128xi32> to vector<16x128xi32>
    %13 = arith.cmpi eq, %11, %12 : vector<16x128xi32>
    %14 = arith.ori %7, %13 : vector<16x128xi1>
    %15 = vector.extract_strided_slice %0 {offsets = [0, 2], sizes = [16, 1], strides = [1, 1]} : vector<16x5xi32> to vector<16x1xi32>
    %c45_i32 = arith.constant 45 : i32
    %16 = vector.broadcast %c45_i32 : i32 to vector<16x1xi32>
    %17 = arith.addi %15, %16 : vector<16x1xi32>
    %18 = vector.broadcast %17 : vector<16x1xi32> to vector<16x128xi32>
    %19 = vector.broadcast %1 : vector<1x128xi32> to vector<16x128xi32>
    %20 = arith.cmpi eq, %18, %19 : vector<16x128xi32>
    %21 = arith.ori %14, %20 : vector<16x128xi1>
    %22 = vector.extract_strided_slice %0 {offsets = [0, 3], sizes = [16, 1], strides = [1, 1]} : vector<16x5xi32> to vector<16x1xi32>
    %c52_i32 = arith.constant 52 : i32
    %23 = vector.broadcast %c52_i32 : i32 to vector<16x1xi32>
    %24 = arith.addi %22, %23 : vector<16x1xi32>
    %25 = vector.broadcast %24 : vector<16x1xi32> to vector<16x128xi32>
    %26 = vector.broadcast %1 : vector<1x128xi32> to vector<16x128xi32>
    %27 = arith.cmpi eq, %25, %26 : vector<16x128xi32>
    %28 = arith.ori %21, %27 : vector<16x128xi1>
    %29 = vector.extract_strided_slice %0 {offsets = [0, 4], sizes = [16, 1], strides = [1, 1]} : vector<16x5xi32> to vector<16x1xi32>
    %c76_i32 = arith.constant 76 : i32
    %30 = vector.broadcast %c76_i32 : i32 to vector<16x1xi32>
    %31 = arith.addi %29, %30 : vector<16x1xi32>
    %32 = vector.broadcast %31 : vector<16x1xi32> to vector<16x128xi32>
    %33 = vector.broadcast %1 : vector<1x128xi32> to vector<16x128xi32>
    %34 = arith.cmpi eq, %32, %33 : vector<16x128xi32>
    %35 = arith.ori %28, %34 : vector<16x128xi1>
    %36 = arith.extui %35 : vector<16x128xi1> to vector<16x128xi32>
    %37 = arith.sitofp %36 : vector<16x128xi32> to vector<16x128xf32>
    %38 = arith.truncf %37 : vector<16x128xf32> to vector<16x128xbf16>
    %c0_1 = arith.constant 0 : index
    %c0_2 = arith.constant 0 : index
    %39 = vector.load %arg2[%c0_1, %c0_2] : memref<128x32xbf16, #tpu.memory_space<vmem>>, vector<128x32xbf16>
    %cst = arith.constant dense<0.000000e+00> : vector<16x32xf32>
    %40 = tpu.matmul %38, %39, %cst {dimension_numbers = #tpu.dot_dimension_numbers<[1], [0], [0], [1], [0, 0, 1, 1], [], []>} : vector<16x128xbf16>, vector<128x32xbf16>, vector<16x32xf32> -> vector<16x32xf32>
    %c0_3 = arith.constant 0 : index
    %c0_4 = arith.constant 0 : index
    %41 = vector.load %arg3[%c0_3, %c0_4] : memref<16x32xf32, #tpu.memory_space<vmem>>, vector<16x32xf32>
    tpu.vector_store %arg3[%c0_3, %c0_4], %40 {strides = array<i32>} : memref<16x32xf32, #tpu.memory_space<vmem>>, vector<16x32xf32>,
    return
  }
  func.func @transform_0(%arg0: i32) -> (i32, i32) {
    %c0_i32 = arith.constant 0 : i32
    %c0_i32_0 = arith.constant 0 : i32
    return %arg0, %c0_i32 : i32, i32
  }
  func.func @transform_1(%arg0: i32) -> (i32, i32) {
    %c0_i32 = arith.constant 0 : i32
    %c0_i32_0 = arith.constant 0 : i32
    %c0_i32_1 = arith.constant 0 : i32
    return %c0_i32, %c0_i32_0 : i32, i32
  }
  func.func @transform_2(%arg0: i32) -> (i32, i32) {
    %c0_i32 = arith.constant 0 : i32
    %c0_i32_0 = arith.constant 0 : i32
    return %arg0, %c0_i32 : i32, i32
  }
}

</mosaic_0001>

<bundles_post_ra>
// kernel: tpu_custom_call.1
= control target key start
LH: loop header
LB: loop body
LE: loop exit
PB: predicated region body
PF: predicated region fallthrough
CT: control target
= control target key end

     0   :  { %v291_v2 = vmov 0   ;;  %v292_v3 = vmov 1   ;;  %v293_v7 = vmov 0.0   ;;  %s369_s0 = inlined_call_operand.vmem [shape: s32[16,5], index: 0, kind: input, shape index: {}]   ;;  %s370_s1 = inlined_call_operand.vmem [shape: bf16[128,32], index: 1, kind: input, shape index: {}]   ;;  %s371_s2 = inlined_call_operand.hbm [shape: f32[16,32], index: 2, kind: output, shape index: {}]  }
   0x1   :  { %v13_v0 = vld [vmem:[%s369_s0] sm:$0xff]  ;;  %v14_v1 = vld [vmem:[%s369_s0 + $0x8] sm:$0xff]  ;;  %251 = vset.pattern.permute.xlu0 %v291_v2  ;;  %252 = vset.pattern.permute.xlu1 %v292_v3  ;;  %v261_v11 = vld [vmem:[%s370_s1 + $0x10] sm:$0xff]  }
   0x2   :  { %v25_v4 = vadd.s32 13, %v13_v0  ;;  %18 = vperm.xlu0 %251, %v13_v0   ;;  %v26_v5 = vadd.s32 13, %v14_v1  ;;  %v259_v6 = vld [vmem:[%s370_s1] sm:$0xff]   ;;  %221 = vmatprep.subr.bf16.mxu0 %v293_v7  ;;  %v260_v8 = vld [vmem:[%s370_s1 + $0x8] sm:$0xff]   ;;  %v37_v9 = vadd.s32 45, %v13_v0  ;;  %v38_v10 = vadd.s32 45, %v14_v1 }
   0x3   :  { %222 = vmatpush3.bf16.msra.mxu0 %v259_v6 }
   0x4   :  { %28 = vperm.xlu1 %252, %v25_v4   ;;  %223 = vmatprep.subr.bf16.mxu0 %v293_v7 }
   0x6   :  { %21 = vperm.xlu0 %251, %v14_v1  }
   0x7   :  { %224 = vmatpush3.bf16.msra.mxu0 %v260_v8 }
   0x8   :  { %31 = vperm.xlu1 %252, %v26_v5  }
   0x9   :  { %7 = vsyncpa [#allocation3], 0  ;;  %v294_v12 = vmov 2   ;;  %225 = vmatprep.subr.bf16.mxu0 %v293_v7  ;;  %v50_v13 = vadd.s32 52, %v14_v1  ;;  %v49_v14 = vadd.s32 52, %v13_v0  ;;  %v262_v15 = vld [vmem:[%s370_s1 + $0x18] sm:$0xff]   ;;  %v15_v28 = vlaneseq }
   0xa   :  { %253 = vset.pattern.permute.xlu0 %v294_v12  ;;  %v295_v16 = vmov 3   ;;  %v263_v17 = vld [vmem:[%s370_s1 + $0x20] sm:$0xff]   ;;  %v61_v18 = vadd.s32 76, %v13_v0  ;;  %v296_v19 = vmov 4   ;;  %v264_v20 = vld [vmem:[%s370_s1 + $0x28] sm:$0xff]   ;;  %v62_v21 = vadd.s32 76, %v14_v1 }
   0xb   :  { %40 = vperm.xlu0 %253, %v37_v9   ;;  %226 = vmatpush3.bf16.msra.mxu0 %v261_v11  ;;  %v265_v22 = vld [vmem:[%s370_s1 + $0x30] sm:$0xff]   ;;  %v266_v23 = vld [vmem:[%s370_s1 + $0x38] sm:$0xff]   ;;  %vm297_vm0 = vmmov 0   ;;  %v16_v30 = vand.u32 127, %v15_v28  ;;  %s298_s1 = smov [#allocation2]  }
   0xc   :  { %254 = vset.pattern.permute.xlu1 %v294_v12  ;;  %227 = vmatprep.subr.bf16.mxu0 %v293_v7  ;;  %s191_s28 = sshll.u32 %s298_s1, 4  ;;  %s192_s28 = int_to_ptr.vmem [resolvable:$true] %s191_s28 }
   0xd   :  { %43 = vperm.xlu1 %254, %v38_v10   ;;  %237 = vmatprep.mubr.msk.bf16.mxu0 %vm297_vm0, %v293_v7  ;;  %s267_s29 = scalar_lea.vmem %s192_s28, 256  ;;  %p272_p1 = scmp.lt.s32.totalorder %s192_s28, %s192_s28 }
   0xe   :  { %p268_p0 = scmp.ne.s32.totalorder %s192_s28, %s267_s29  ;;  %p273_p2 = scmp.lt.s32.totalorder %s267_s29, %s267_s29 }
   0xf   :  { %256 = vset.pattern.permute.xlu0 %v295_v16  ;;  %228 = vmatpush3.bf16.msra.mxu0 %v262_v15 }
  0x10   :  { %55 = vperm.xlu0 %256, %v50_v13   ;;  %229 = vmatprep.subr.bf16.mxu0 %v293_v7  ;;  %p274_p3 = por %p273_p2, %p272_p1 }
  0x11   :  { %255 = vset.pattern.permute.xlu1 %v295_v16 }
  0x12   :  { %52 = vperm.xlu1 %255, %v49_v14   ;;  %p275_p4 = pnand %p274_p3, %p268_p0 }
  0x13   :  { %230 = vmatpush3.bf16.msra.mxu0 %v263_v17 }
  0x14   :  { %258 = vset.pattern.permute.xlu0 %v296_v19  ;;  %231 = vmatprep.subr.bf16.mxu0 %v293_v7 }
  0x16   :  { %257 = vset.pattern.permute.xlu1 %v296_v19 }
  0x17   :  { %64 = vperm.xlu1 %257, %v61_v18   ;;  %232 = vmatpush3.bf16.msra.mxu0 %v264_v20 }
  0x18   :  { %233 = vmatprep.subr.bf16.mxu0 %v293_v7 }
  0x1b   :  { %67 = vperm.xlu1 %257, %v62_v21   ;;  %234 = vmatpush3.bf16.msra.mxu0 %v265_v22 }
  0x1c   :  { %235 = vmatprep.subr.bf16.mxu0 %v293_v7 }
  0x1f   :  { %236 = vmatpush3.bf16.msra.mxu0 %v266_v23 }
  0x81   :  { %v19_v24 = vpop.permute.xlu0 %18 }
  0x82   :  { %vm23_vm1 = vcmp.eq.s32.totalorder %v19_v24, %v16_v30 }
  0x83   :  { %v29_v25 = vpop.permute.xlu1 %28 }
  0x84   :  { %vm33_vm2 = vcmp.eq.s32.totalorder %v29_v25, %v16_v30 }
  0x85   :  { %v22_v27 = vpop.permute.xlu0 %21  ;;  %vm35_vm6 = vmor %vm23_vm1, %vm33_vm2 }
  0x86   :  { %vm24_vm3 = vcmp.eq.s32.totalorder %v22_v27, %v16_v30 }
  0x87   :  { %v32_v26 = vpop.permute.xlu1 %31 }
  0x88   :  { %vm34_vm4 = vcmp.eq.s32.totalorder %v32_v26, %v16_v30 }
  0x89   :  { %vm36_vm8 = vmor %vm24_vm3, %vm34_vm4  ;;  %vm183_vm3 = vcmask 261120  }
  0x8a   :  { %v41_v31 = vpop.permute.xlu0 %40 }
  0x8b   :  { %vm45_vm5 = vcmp.eq.s32.totalorder %v41_v31, %v16_v30 }
  0x8c   :  { %v44_v29 = vpop.permute.xlu1 %43  ;;  %vm47_vm10 = vmor %vm35_vm6, %vm45_vm5 }
  0x8d   :  { %vm46_vm7 = vcmp.eq.s32.totalorder %v44_v29, %v16_v30 }
  0x8e   :  { %vm48_vm12 = vmor %vm36_vm8, %vm46_vm7 }
  0x8f   :  { %v56_v33 = vpop.permute.xlu0 %55 }
  0x90   :  { %vm58_vm13 = vcmp.eq.s32.totalorder %v56_v33, %v16_v30 }
  0x91   :  { %v53_v32 = vpop.permute.xlu1 %52  ;;  %vm60_vm0 = vmor %vm48_vm12, %vm58_vm13 }
  0x92   :  { %vm57_vm9 = vcmp.eq.s32.totalorder %v53_v32, %v16_v30 }
  0x93   :  { %vm59_vm14 = vmor %vm47_vm10, %vm57_vm9 }
  0x96   :  { %v65_v34 = vpop.permute.xlu1 %64 }
  0x97   :  { %vm69_vm11 = vcmp.eq.s32.totalorder %v65_v34, %v16_v30 }
  0x98   :  { %vm71_vm15 = vmor %vm59_vm14, %vm69_vm11 }
  0x99   :  { %v202_v36 = vsel %vm71_vm15, 1.0, %v293_v7 }
  0x9a   :  { %v68_v35 = vpop.permute.xlu1 %67 }
  0x9b   :  { %vm70_vm1 = vcmp.eq.s32.totalorder %v68_v35, %v16_v30 }
  0x9c   :  { %vm72_vm2 = vmor %vm60_vm0, %vm70_vm1 }
  0x9d   :  { %v203_v37 = vsel %vm72_vm2, 1.0, %v293_v7 }
  0x9e   :  { %v77_v38 = vpack.c.bf16 %v203_v37, %v202_v36 }
  0xa0   :  { %238 = vmatmul.mubr.bf16.vlgmr.msra.gmra.mrb[0].mxu0 %v77_v38 }
 0x173   :  { %v176_v39 = vpop.f32.mrb[0].mxu0 }
 0x174   :  { %184 = vst.msk [vmem:[#allocation2] sm:$0xff] %vm183_vm3, %v176_v39  ;;  %v239_v40 = vpop.f32.mrb[1].mxu0 }
 0x175   :  { %v179_v41 = vpop.f32.mrb[2].mxu0 }
 0x176   :  { %185 = vst.msk [vmem:[#allocation2 + $0x8] sm:$0xff] %vm183_vm3, %v179_v41  ;;  %v240_v42 = vpop.f32.mrb[3].mxu0 }
 0x177   :  { %278 = shalt.err (!%p275_p4)
}
 0x178   :  { %s279_s4 = scalar_lea.hbm %s371_s2, 256 }
 0x179   :  { %p280_p5 = scmp.ne.s32.totalorder %s371_s2, %s279_s4  ;;  %p283_p6 = scmp.lt.u32.totalorder %s279_s4, %s371_s2 }
 0x17b   :  { %p285_p7 = pnand %p283_p6, %p280_p5 }
 0x17d   :  { %288 = shalt.err (!%p285_p7)
}
 0x17e   :  { %s299_s9 = smov 128   ;;  %s300_s10 = smov 8  }
 0x17f   :  { %197 = dma.vmem_to_hbm [thread:$0]  %s192_s28, 256, %s371_s2, [#allocation3], %s299_s9, %s299_s9, %s300_s10  }
 0x180   :  { %289 = dma.done.wait [#allocation3], 256  }
 0x181   :  { %290 = vsyncadd [#allocation3], 4294967040 }
 0x182   :  { %201 = vsyncpa [#allocation3], 1 }

</bundles_post_ra>
